<compile_context>
chip_gen: v5e
topology: v5e:2x2
jax: 0.10.0
libtpu: 0.0.40
codegen_flags: <defaults>
</compile_context>

<pallas_src>
import jax
import jax.numpy as jnp
from jax import lax
from jax.experimental import pallas as pl
from jax.experimental.pallas import tpu as pltpu


def _round_up(x: int, m: int) -> int:
    return ((x + m - 1) // m) * m


def _pad2(x: jax.Array, rows: int, cols: int) -> jax.Array:
    r, c = x.shape
    if r == rows and c == cols:
        return x
    return jnp.pad(x, ((0, rows - r), (0, cols - c)))


def _make_mnrl_kernel(scale: float, n_valid: int, n_tile: int, nk: int,
                      needs_mask: bool, mm_dtype):
    """Returns the kernel body, closing over static configuration."""

    def kernel(a_ref, c_ref, p_ref, o_ref, an_scr, m_scr, l_scr):
        k = pl.program_id(1)

        # --- init (first candidate tile): normalize+scale anchors, reset stats ---
        @pl.when(k == 0)
        def _init():
            a = a_ref[...].astype(jnp.float32)                       # [Bt, Dp]
            ss = jnp.sum(a * a, axis=1, keepdims=True)
            # 1/max(||a||, 1e-12) == rsqrt(max(||a||^2, 1e-24)); fold in `scale`.
            inv = lax.rsqrt(jnp.maximum(ss, 1e-24)) * scale
            an_scr[...] = (a * inv).astype(an_scr.dtype)
            m_scr[...] = jnp.full_like(m_scr, -jnp.inf)
            l_scr[...] = jnp.zeros_like(l_scr)

        # --- normalize this candidate tile ---
        c = c_ref[...].astype(jnp.float32)                           # [Nt, Dp]
        inv_c = lax.rsqrt(jnp.maximum(jnp.sum(c * c, axis=1, keepdims=True), 1e-24))
        c_mm = (c * inv_c).astype(mm_dtype)

        # --- transpose-free MXU matmul: [Bt, Dp] x [Nt, Dp] -> [Bt, Nt] ---
        s = lax.dot_general(
            an_scr[...], c_mm,
            dimension_numbers=(((1,), (1,)), ((), ())),
            preferred_element_type=jnp.float32,
        )

        if needs_mask:
            # Mask padded candidate columns (only the trailing pad region).
            col = k * n_tile + lax.broadcasted_iota(jnp.int32, (1, n_tile), 1)
            s = jnp.where(col < n_valid, s, -1e30)

        # --- online logsumexp update ---
        m_prev = m_scr[...]
        m_new = jnp.maximum(m_prev, jnp.max(s, axis=1, keepdims=True))
        l_scr[...] = (l_scr[...] * jnp.exp(m_prev - m_new)
                      + jnp.sum(jnp.exp(s - m_new), axis=1, keepdims=True))
        m_scr[...] = m_new

        # --- finalize: diagonal via O(B*D) row-dot with the positives ---
        @pl.when(k == nk - 1)
        def _finalize():
            p = p_ref[...].astype(jnp.float32)                       # [Bt, Dp]
            inv_p = lax.rsqrt(jnp.maximum(jnp.sum(p * p, axis=1, keepdims=True), 1e-24))
            # Round through mm_dtype so the diagonal matches the matmul path.
            p_n = (p * inv_p).astype(mm_dtype).astype(jnp.float32)
            a_n = an_scr[...].astype(jnp.float32)                    # already * scale
            diag = jnp.sum(a_n * p_n, axis=1, keepdims=True)         # [Bt, 1]
            lse = m_scr[...] + jnp.log(l_scr[...])                   # [Bt, 1]
            o_ref[...] = lse - diag

    return kernel


def mnrl_loss_pallas(anchors: jax.Array, candidates: jax.Array,
                     scale: float = 20.0, mm_dtype=None,
                     b_tile: int = 128, n_tile: int = 512) -> jax.Array:
    """anchors: [B, D], candidates: [N, D] (N >= B) -> scalar loss (float32)."""
    B, D = anchors.shape
    N, D2 = candidates.shape
    assert D == D2 and N >= B, "candidates must be [N>=B, D]"

    if mm_dtype is None:
        mm_dtype = jnp.bfloat16 if anchors.dtype == jnp.bfloat16 else jnp.float32
    mm_dtype = jnp.dtype(mm_dtype)

    # Tile / pad plan (lane = 128, sublane = 8).
    d_pad = _round_up(D, 128)
    bt = min(b_tile, _round_up(B, 8))
    b_pad = _round_up(B, bt)

    # Keep the double-buffered candidate tile DMA under ~8 MiB so the whole
    # working set (anchors + positives + candidates x2 + scratch) stays well
    # inside the 32 MiB scoped-VMEM budget (safe on v5e/v6e/v7x).
    cand_bytes = max(jnp.dtype(candidates.dtype).itemsize, 4)
    max_nt = max(128, (8 * 1024 * 1024) // (2 * d_pad * cand_bytes) // 128 * 128)
    nt = min(n_tile, max_nt, _round_up(N, 128))
    n_pad = _round_up(N, nt)
    nk = n_pad // nt

    a_p = _pad2(anchors, b_pad, d_pad)
    c_p = _pad2(candidates, n_pad, d_pad)
    p_p = _pad2(candidates[:B], b_pad, d_pad)   # positives: candidates[i] for anchor i

    kernel = _make_mnrl_kernel(float(scale), N, nt, nk,
                               needs_mask=(n_pad != N), mm_dtype=mm_dtype)

    row_loss = pl.pallas_call(
        kernel,
        out_shape=jax.ShapeDtypeStruct((b_pad, 1), jnp.float32),
        grid=(b_pad // bt, nk),
        in_specs=[
            pl.BlockSpec((bt, d_pad), lambda i, k: (i, 0)),   # anchors (resident per i)
            pl.BlockSpec((nt, d_pad), lambda i, k: (k, 0)),   # candidates (pipelined)
            pl.BlockSpec((bt, d_pad), lambda i, k: (i, 0)),   # positives (resident per i)
        ],
        out_specs=pl.BlockSpec((bt, 1), lambda i, k: (i, 0)),
        scratch_shapes=[
            pltpu.VMEM((bt, d_pad), mm_dtype),    # scaled + normalized anchors
            pltpu.VMEM((bt, 1), jnp.float32),     # running max
            pltpu.VMEM((bt, 1), jnp.float32),     # running sum(exp)
        ],
        compiler_params=pltpu.CompilerParams(
            dimension_semantics=("parallel", "arbitrary"),
            vmem_limit_bytes=32 * 1024 * 1024,
        ),
    )(a_p, c_p, p_p)

    # Glue: mean over the valid anchor rows (padded rows excluded).
    return jnp.mean(row_loss[:B, 0])


def reference_loss(anchors, candidates, scale=20.0):
    """Pure-JAX reference for validation (matches the PyTorch module)."""
    a = anchors / jnp.maximum(jnp.linalg.norm(anchors, axis=1, keepdims=True), 1e-12)
    b = candidates / jnp.maximum(jnp.linalg.norm(candidates, axis=1, keepdims=True), 1e-12)
    scores = (a @ b.T) * scale
    labels = jnp.arange(scores.shape[0])
    logz = jax.scipy.special.logsumexp(scores, axis=1)
    return jnp.mean(logz - scores[labels, labels])


if __name__ == "__main__":
    key = jax.random.PRNGKey(0)

    # --- Test 1: small deterministic setup mirroring the module -------------
    # 3 sentence-feature groups (anchor, positive, hard-negative),
    # batch B=8, feature dim F=16, embed D=32.  The "model" is a linear encoder.
    B, F, D = 8, 16, 32
    k_feat, k_w, k_a2, k_c2 = jax.random.split(key, 4)

    feats = jax.random.normal(k_feat, (3, B, F), dtype=jnp.float32)
    W = jax.random.normal(k_w, (F, D), dtype=jnp.float32) * 0.1   # encoder (glue)

    embeddings = [feats[i] @ W for i in range(3)]
    anchors = embeddings[0]                                # [B, D]
    candidates = jnp.concatenate(embeddings[1:], axis=0)   # [2B, D]

    loss = jax.block_until_ready(mnrl_loss_pallas(anchors, candidates, scale=20.0))
    ref = reference_loss(anchors, candidates, scale=20.0)
    assert jnp.allclose(loss, ref, rtol=1e-4, atol=1e-4), (loss, ref)

    # bf16 MXU path (perf mode): same semantics up to bf16 rounding of operands.
    loss_bf16 = jax.block_until_ready(
        mnrl_loss_pallas(anchors.astype(jnp.bfloat16),
                         candidates.astype(jnp.bfloat16), scale=20.0))
    assert bool(jnp.isfinite(loss_bf16)) and abs(float(loss_bf16) - float(ref)) < 0.1, (
        loss_bf16, ref)

    # --- Test 2: multi-candidate-tile + masked-padding path -----------------
    # N not a multiple of the candidate tile -> exercises online softmax across
    # several k tiles and the trailing-pad mask.
    B2, D2, N2 = 8, 48, 320
    anchors2 = jax.random.normal(k_a2, (B2, D2), dtype=jnp.float32)
    candidates2 = jax.random.normal(k_c2, (N2, D2), dtype=jnp.float32)
    candidates2 = candidates2.at[:B2].set(anchors2 + 0.05 * candidates2[:B2])

    loss2 = jax.block_until_ready(
        mnrl_loss_pallas(anchors2, candidates2, scale=20.0, n_tile=128))
    ref2 = reference_loss(anchors2, candidates2, scale=20.0)
    assert jnp.allclose(loss2, ref2, rtol=1e-4, atol=1e-4), (loss2, ref2)

    print("KERNEL_OK")
</pallas_src>

<mosaic_0001>
module attributes {stable_mosaic.version = 11 : i64} {
  func.func @kernel(%arg0: i32, %arg1: i32, %arg2: memref<8x128xf32, #tpu.memory_space<vmem>>, %arg3: memref<128x128xf32, #tpu.memory_space<vmem>>, %arg4: memref<8x128xf32, #tpu.memory_space<vmem>>, %arg5: memref<8x1xf32, #tpu.memory_space<vmem>>, %arg6: memref<8x128xf32, #tpu.memory_space<vmem>>, %arg7: memref<8x1xf32, #tpu.memory_space<vmem>>, %arg8: memref<8x1xf32, #tpu.memory_space<vmem>>) attributes {dimension_semantics = [#tpu.dimension_semantics<parallel>, #tpu.dimension_semantics<arbitrary>], iteration_bounds = array<i64: 1, 1>, scalar_prefetch = 0 : i64, scratch_operands = 3 : i64, tpu.core_type = #tpu.core_type<tc>, window_params = [{transform_indices = @transform_0, window_bounds = array<i64: 8, 128>}, {transform_indices = @transform_1, window_bounds = array<i64: 128, 128>}, {transform_indices = @transform_2, window_bounds = array<i64: 8, 128>}, {transform_indices = @transform_3, window_bounds = array<i64: 8, 1>}]} {
    %c0_i32 = arith.constant 0 : i32
    %0 = arith.cmpi eq, %arg1, %c0_i32 : i32
    %1 = arith.extui %0 : i1 to i32
    %c0_i32_0 = arith.constant 0 : i32
    %2 = arith.cmpi ne, %1, %c0_i32_0 : i32
    scf.if %2 {
      %c0_19 = arith.constant 0 : index
      %c0_20 = arith.constant 0 : index
      %43 = vector.load %arg2[%c0_19, %c0_20] : memref<8x128xf32, #tpu.memory_space<vmem>>, vector<8x128xf32>
      %44 = arith.mulf %43, %43 : vector<8x128xf32>
      %cst_21 = arith.constant dense<0.000000e+00> : vector<8xf32>
      %45 = vector.multi_reduction <add>, %44, %cst_21 [1] : vector<8x128xf32> to vector<8xf32>
      %46 = vector.shape_cast %45 : vector<8xf32> to vector<8x1xf32>
      %cst_22 = arith.constant 1.000000e-24 : f32
      %47 = vector.broadcast %cst_22 : f32 to vector<8x1xf32>
      %48 = arith.maximumf %46, %47 : vector<8x1xf32>
      %49 = math.rsqrt %48 : vector<8x1xf32>
      %cst_23 = arith.constant 2.000000e+01 : f32
      %50 = vector.broadcast %cst_23 : f32 to vector<8x1xf32>
      %51 = arith.mulf %49, %50 : vector<8x1xf32>
      %52 = vector.broadcast %51 : vector<8x1xf32> to vector<8x128xf32>
      %53 = arith.mulf %43, %52 : vector<8x128xf32>
      %c0_24 = arith.constant 0 : index
      %c0_25 = arith.constant 0 : index
      %54 = vector.load %arg6[%c0_24, %c0_25] : memref<8x128xf32, #tpu.memory_space<vmem>>, vector<8x128xf32>
      tpu.vector_store %arg6[%c0_24, %c0_25], %53 {strides = array<i32>} : memref<8x128xf32, #tpu.memory_space<vmem>>, vector<8x128xf32>,
      %cst_26 = arith.constant 0xFF800000 : f32
      %55 = vector.broadcast %cst_26 : f32 to vector<8x1xf32>
      %c0_27 = arith.constant 0 : index
      %c0_28 = arith.constant 0 : index
      %56 = vector.load %arg7[%c0_27, %c0_28] : memref<8x1xf32, #tpu.memory_space<vmem>>, vector<8x1xf32>
      tpu.vector_store %arg7[%c0_27, %c0_28], %55 {strides = array<i32>} : memref<8x1xf32, #tpu.memory_space<vmem>>, vector<8x1xf32>,
      %cst_29 = arith.constant 0.000000e+00 : f32
      %57 = vector.broadcast %cst_29 : f32 to vector<8x1xf32>
      %c0_30 = arith.constant 0 : index
      %c0_31 = arith.constant 0 : index
      %58 = vector.load %arg8[%c0_30, %c0_31] : memref<8x1xf32, #tpu.memory_space<vmem>>, vector<8x1xf32>
      tpu.vector_store %arg8[%c0_30, %c0_31], %57 {strides = array<i32>} : memref<8x1xf32, #tpu.memory_space<vmem>>, vector<8x1xf32>,
    } else {
    }
    %c0 = arith.constant 0 : index
    %c0_1 = arith.constant 0 : index
    %3 = vector.load %arg3[%c0, %c0_1] : memref<128x128xf32, #tpu.memory_space<vmem>>, vector<128x128xf32>
    %4 = arith.mulf %3, %3 : vector<128x128xf32>
    %cst = arith.constant dense<0.000000e+00> : vector<128xf32>
    %5 = vector.multi_reduction <add>, %4, %cst [1] : vector<128x128xf32> to vector<128xf32>
    %6 = vector.shape_cast %5 : vector<128xf32> to vector<128x1xf32>
    %cst_2 = arith.constant 1.000000e-24 : f32
    %7 = vector.broadcast %cst_2 : f32 to vector<128x1xf32>
    %8 = arith.maximumf %6, %7 : vector<128x1xf32>
    %9 = math.rsqrt %8 : vector<128x1xf32>
    %10 = vector.broadcast %9 : vector<128x1xf32> to vector<128x128xf32>
    %11 = arith.mulf %3, %10 : vector<128x128xf32>
    %c0_3 = arith.constant 0 : index
    %c0_4 = arith.constant 0 : index
    %12 = vector.load %arg6[%c0_3, %c0_4] : memref<8x128xf32, #tpu.memory_space<vmem>>, vector<8x128xf32>
    %cst_5 = arith.constant dense<0.000000e+00> : vector<8x128xf32>
    %13 = tpu.matmul %12, %11, %cst_5 {dimension_numbers = #tpu.dot_dimension_numbers<[1], [1], [0], [0], [0, 0, 1, 0], [], []>} : vector<8x128xf32>, vector<128x128xf32>, vector<8x128xf32> -> vector<8x128xf32>
    %c128_i32 = arith.constant 128 : i32
    %14 = arith.muli %arg1, %c128_i32 : i32
    %15 = tpu.iota {dimensions = array<i32: 1>} : vector<1x128xi32>
    %16 = vector.broadcast %14 : i32 to vector<1x128xi32>
    %17 = arith.addi %16, %15 : vector<1x128xi32>
    %c16_i32 = arith.constant 16 : i32
    %18 = vector.broadcast %c16_i32 : i32 to vector<1x128xi32>
    %19 = arith.cmpi slt, %17, %18 : vector<1x128xi32>
    %cst_6 = arith.constant -1.000000e+30 : f32
    %20 = vector.shape_cast %19 : vector<1x128xi1> to vector<1x128xi1>
    %21 = vector.broadcast %20 : vector<1x128xi1> to vector<8x128xi1>
    %22 = vector.broadcast %cst_6 : f32 to vector<8x128xf32>
    %23 = arith.select %21, %13, %22 : vector<8x128xi1>, vector<8x128xf32>
    %c0_7 = arith.constant 0 : index
    %c0_8 = arith.constant 0 : index
    %24 = vector.load %arg7[%c0_7, %c0_8] : memref<8x1xf32, #tpu.memory_space<vmem>>, vector<8x1xf32>
    %cst_9 = arith.constant dense<0xFF800000> : vector<8xf32>
    %25 = vector.multi_reduction <maximumf>, %23, %cst_9 [1] : vector<8x128xf32> to vector<8xf32>
    %26 = vector.shape_cast %25 : vector<8xf32> to vector<8x1xf32>
    %27 = arith.maximumf %24, %26 : vector<8x1xf32>
    %c0_10 = arith.constant 0 : index
    %c0_11 = arith.constant 0 : index
    %28 = vector.load %arg8[%c0_10, %c0_11] : memref<8x1xf32, #tpu.memory_space<vmem>>, vector<8x1xf32>
    %29 = arith.subf %24, %27 : vector<8x1xf32>
    %30 = math.exp %29 : vector<8x1xf32>
    %31 = arith.mulf %28, %30 : vector<8x1xf32>
    %32 = vector.broadcast %27 : vector<8x1xf32> to vector<8x128xf32>
    %33 = arith.subf %23, %32 : vector<8x128xf32>
    %34 = math.exp %33 : vector<8x128xf32>
    %cst_12 = arith.constant dense<0.000000e+00> : vector<8xf32>
    %35 = vector.multi_reduction <add>, %34, %cst_12 [1] : vector<8x128xf32> to vector<8xf32>
    %36 = vector.shape_cast %35 : vector<8xf32> to vector<8x1xf32>
    %37 = arith.addf %31, %36 : vector<8x1xf32>
    %c0_13 = arith.constant 0 : index
    %c0_14 = arith.constant 0 : index
    %38 = vector.load %arg8[%c0_13, %c0_14] : memref<8x1xf32, #tpu.memory_space<vmem>>, vector<8x1xf32>
    tpu.vector_store %arg8[%c0_13, %c0_14], %37 {strides = array<i32>} : memref<8x1xf32, #tpu.memory_space<vmem>>, vector<8x1xf32>,
    %c0_15 = arith.constant 0 : index
    %c0_16 = arith.constant 0 : index
    %39 = vector.load %arg7[%c0_15, %c0_16] : memref<8x1xf32, #tpu.memory_space<vmem>>, vector<8x1xf32>
    tpu.vector_store %arg7[%c0_15, %c0_16], %27 {strides = array<i32>} : memref<8x1xf32, #tpu.memory_space<vmem>>, vector<8x1xf32>,
    %c0_i32_17 = arith.constant 0 : i32
    %40 = arith.cmpi eq, %arg1, %c0_i32_17 : i32
    %41 = arith.extui %40 : i1 to i32
    %c0_i32_18 = arith.constant 0 : i32
    %42 = arith.cmpi ne, %41, %c0_i32_18 : i32
    scf.if %42 {
      %c0_19 = arith.constant 0 : index
      %c0_20 = arith.constant 0 : index
      %43 = vector.load %arg4[%c0_19, %c0_20] : memref<8x128xf32, #tpu.memory_space<vmem>>, vector<8x128xf32>
      %44 = arith.mulf %43, %43 : vector<8x128xf32>
      %cst_21 = arith.constant dense<0.000000e+00> : vector<8xf32>
      %45 = vector.multi_reduction <add>, %44, %cst_21 [1] : vector<8x128xf32> to vector<8xf32>
      %46 = vector.shape_cast %45 : vector<8xf32> to vector<8x1xf32>
      %cst_22 = arith.constant 1.000000e-24 : f32
      %47 = vector.broadcast %cst_22 : f32 to vector<8x1xf32>
      %48 = arith.maximumf %46, %47 : vector<8x1xf32>
      %49 = math.rsqrt %48 : vector<8x1xf32>
      %50 = vector.broadcast %49 : vector<8x1xf32> to vector<8x128xf32>
      %51 = arith.mulf %43, %50 : vector<8x128xf32>
      %c0_23 = arith.constant 0 : index
      %c0_24 = arith.constant 0 : index
      %52 = vector.load %arg6[%c0_23, %c0_24] : memref<8x128xf32, #tpu.memory_space<vmem>>, vector<8x128xf32>
      %53 = arith.mulf %52, %51 : vector<8x128xf32>
      %cst_25 = arith.constant dense<0.000000e+00> : vector<8xf32>
      %54 = vector.multi_reduction <add>, %53, %cst_25 [1] : vector<8x128xf32> to vector<8xf32>
      %55 = vector.shape_cast %54 : vector<8xf32> to vector<8x1xf32>
      %c0_26 = arith.constant 0 : index
      %c0_27 = arith.constant 0 : index
      %56 = vector.load %arg7[%c0_26, %c0_27] : memref<8x1xf32, #tpu.memory_space<vmem>>, vector<8x1xf32>
      %c0_28 = arith.constant 0 : index
      %c0_29 = arith.constant 0 : index
      %57 = vector.load %arg8[%c0_28, %c0_29] : memref<8x1xf32, #tpu.memory_space<vmem>>, vector<8x1xf32>
      %58 = math.log %57 : vector<8x1xf32>
      %59 = arith.addf %56, %58 : vector<8x1xf32>
      %60 = arith.subf %59, %55 : vector<8x1xf32>
      %c0_30 = arith.constant 0 : index
      %c0_31 = arith.constant 0 : index
      %61 = vector.load %arg5[%c0_30, %c0_31] : memref<8x1xf32, #tpu.memory_space<vmem>>, vector<8x1xf32>
      tpu.vector_store %arg5[%c0_30, %c0_31], %60 {strides = array<i32>} : memref<8x1xf32, #tpu.memory_space<vmem>>, vector<8x1xf32>,
    } else {
    }
    return
  }
  func.func @transform_0(%arg0: i32, %arg1: i32) -> (i32, i32) {
    %c0_i32 = arith.constant 0 : i32
    %c0_i32_0 = arith.constant 0 : i32
    return %arg0, %c0_i32 : i32, i32
  }
  func.func @transform_1(%arg0: i32, %arg1: i32) -> (i32, i32) {
    %c0_i32 = arith.constant 0 : i32
    %c0_i32_0 = arith.constant 0 : i32
    return %arg1, %c0_i32 : i32, i32
  }
  func.func @transform_2(%arg0: i32, %arg1: i32) -> (i32, i32) {
    %c0_i32 = arith.constant 0 : i32
    %c0_i32_0 = arith.constant 0 : i32
    return %arg0, %c0_i32 : i32, i32
  }
  func.func @transform_3(%arg0: i32, %arg1: i32) -> (i32, i32) {
    %c0_i32 = arith.constant 0 : i32
    %c0_i32_0 = arith.constant 0 : i32
    return %arg0, %c0_i32 : i32, i32
  }
}

</mosaic_0001>

<bundles_post_ra>
// kernel: tpu_custom_call.1
= control target key start
LH: loop header
LB: loop body
LE: loop exit
PB: predicated region body
PF: predicated region fallthrough
CT: control target
= control target key end

     0   :  { %8 = vsyncpa [#allocation6], 0  ;;  %s949_s0 = inlined_call_operand.hbm [shape: f32[8,128], index: 0, kind: input, shape index: {}]   ;;  %s950_s1 = inlined_call_operand.hbm [shape: f32[128,128], index: 1, kind: input, shape index: {}]   ;;  %s951_s2 = inlined_call_operand.hbm [shape: f32[8,128], index: 2, kind: input, shape index: {}]   ;;  %s952_s3 = inlined_call_operand.vmem [shape: f32[8,1], index: 3, kind: output, shape index: {}]  }
   0x1   :  { %9 = vsyncpa [#allocation8], 0  ;;  %s25_s14 = sshll.u32 %s950_s1, 4  ;;  %s554_s15 = smov [#allocation7]   ;;  %s26_s14 = int_to_ptr.hbm [resolvable:$true] %s25_s14 }
   0x2   :  { %s27_s16 = sshll.u32 %s554_s15, 4  ;;  %s15_s19 = sshll.u32 %s949_s0, 4  ;;  %s28_s16 = int_to_ptr.vmem [resolvable:$true] %s27_s16  ;;  %s16_s19 = int_to_ptr.hbm [resolvable:$true] %s15_s19 }
   0x3   :  { %s555_s20 = smov 128   ;;  %s556_s21 = smov 8  }
   0x4   :  { %33 = dma.hbm_to_vmem [thread:$0]  %s26_s14, 2048, %s28_s16, [#allocation8], %s555_s20, %s555_s20, %s556_s21  }
   0x5   :  { %s557_s22 = smov [#allocation5]   ;;  %s39_s26 = sshll.u32 %s951_s2, 4  ;;  %s40_s26 = int_to_ptr.hbm [resolvable:$true] %s39_s26 }
   0x6   :  { %s17_s23 = sshll.u32 %s557_s22, 4  ;;  %s558_s1 = smov [#allocation9]   ;;  %s18_s23 = int_to_ptr.vmem [resolvable:$true] %s17_s23 }
   0x7   :  { %20 = dma.hbm_to_vmem [thread:$0]  %s16_s19, 128, %s18_s23, [#allocation6]  }
   0x8   :  { %s41_s27 = sshll.u32 %s558_s1, 4  ;;  %s42_s27 = int_to_ptr.vmem [resolvable:$true] %s41_s27 }
   0x9   :  { %44 = dma.hbm_to_vmem [thread:$0]  %s40_s26, 128, %s42_s27, [#allocation8]  }
   0xa   :  { %550 = dma.done.wait [#allocation6], 128  }
   0xb   :  { %551 = vsyncadd [#allocation6], 4294967168 }
   0xc   :  { %552 = dma.done.wait [#allocation8], 2176  }
   0xd   :  { %553 = vsyncadd [#allocation8], 4294965120  ;;  %v591_v0 = vld [vmem:[#allocation7 + $0x78] sm:$0xff]  ;;  %v593_v1 = vld [vmem:[#allocation7 + $0x68] sm:$0xff] }
   0xe   :  { %v595_v2 = vld [vmem:[#allocation7 + $0x58] sm:$0xff]  ;;  %v113_v3 = vmul.f32 %v591_v0, %v591_v0  ;;  %v111_v4 = vmul.f32 %v593_v1, %v593_v1  ;;  %v603_v6 = vld [vmem:[#allocation7 + $0x70] sm:$0xff]  ;;  %v605_v7 = vld [vmem:[#allocation7 + $0x60] sm:$0xff] }
   0xf   :  { %v109_v5 = vmul.f32 %v595_v2, %v595_v2  ;;  %v607_v8 = vld [vmem:[#allocation7 + $0x50] sm:$0xff]  ;;  %v112_v9 = vmul.f32 %v603_v6, %v603_v6  ;;  %v110_v10 = vmul.f32 %v605_v7, %v605_v7  ;;  %v615_v12 = vld [vmem:[#allocation7 + $0x48] sm:$0xff]  ;;  %v617_v13 = vld [vmem:[#allocation7 + $0x40] sm:$0xff] }
  0x10   :  { %144 = vadd.xlane.f32.xlu0 %v113_v3  ;;  %140 = vadd.xlane.f32.xlu1 %v111_v4  ;;  %v108_v11 = vmul.f32 %v607_v8, %v607_v8  ;;  %v619_v14 = vld [vmem:[#allocation7 + $0x38] sm:$0xff]  ;;  %v107_v15 = vmul.f32 %v615_v12, %v615_v12  ;;  %v106_v16 = vmul.f32 %v617_v13, %v617_v13  ;;  %v627_v18 = vld [vmem:[#allocation7 + $0x30] sm:$0xff]  ;;  %v629_v19 = vld [vmem:[#allocation7 + $0x28] sm:$0xff] }
  0x11   :  { %136 = vadd.xlane.f32.xlu2 %v109_v5  ;;  %v105_v17 = vmul.f32 %v619_v14, %v619_v14  ;;  %v631_v20 = vld [vmem:[#allocation7 + $0x20] sm:$0xff]  ;;  %v104_v21 = vmul.f32 %v627_v18, %v627_v18  ;;  %v103_v22 = vmul.f32 %v629_v19, %v629_v19  ;;  %v639_v24 = vld [vmem:[#allocation7 + $0x10] sm:$0xff]  ;;  %v641_v25 = vld [vmem:[#allocation7 + $0x18] sm:$0xff] }
  0x12   :  { %v102_v23 = vmul.f32 %v631_v20, %v631_v20  ;;  %v643_v26 = vld [vmem:[#allocation7 + $0x8] sm:$0xff]  ;;  %v100_v27 = vmul.f32 %v639_v24, %v639_v24  ;;  %v101_v28 = vmul.f32 %v641_v25, %v641_v25  ;;  %v651_v30 = vld [vmem:[#allocation5] sm:$0xff]  ;;  %v653_v31 = vld [vmem:[#allocation7] sm:$0xff] }
  0x13   :  { %v99_v29 = vmul.f32 %v643_v26, %v643_v26  ;;  %v62_v32 = vmul.f32 %v651_v30, %v651_v30  ;;  %v98_v33 = vmul.f32 %v653_v31, %v653_v31  ;;  %v659_v34 = vld [vmem:[#allocation9] sm:$0xff] }
  0x14   :  { %v395_v35 = vmul.f32 %v659_v34, %v659_v34 }
  0x18   :  { %142 = vadd.xlane.f32.xlu0 %v112_v9  ;;  %138 = vadd.xlane.f32.xlu1 %v110_v10 }
  0x19   :  { %134 = vadd.xlane.f32.xlu2 %v108_v11 }
  0x20   :  { %132 = vadd.xlane.f32.xlu0 %v107_v15  ;;  %130 = vadd.xlane.f32.xlu1 %v106_v16 }
  0x21   :  { %128 = vadd.xlane.f32.xlu2 %v105_v17 }
  0x28   :  { %126 = vadd.xlane.f32.xlu0 %v104_v21  ;;  %124 = vadd.xlane.f32.xlu1 %v103_v22 }
  0x29   :  { %122 = vadd.xlane.f32.xlu2 %v102_v23 }
  0x30   :  { %118 = vadd.xlane.f32.xlu1 %v100_v27  ;;  %120 = vadd.xlane.f32.xlu0 %v101_v28 }
  0x31   :  { %116 = vadd.xlane.f32.xlu2 %v99_v29 }
  0x38   :  { %63 = vadd.xlane.f32.xlu1 %v62_v32  ;;  %114 = vadd.xlane.f32.xlu0 %v98_v33 }
  0x40   :  { %396 = vadd.xlane.f32.xlu1 %v395_v35 }
  0x83   :  { %v145_v36 = vpop.xlane.xlu0 %144  ;;  %v141_v37 = vpop.xlane.xlu1 %140 }
  0x84   :  { %v161_v38 = vmax.f32 %v145_v36, 1e-24  ;;  %v663_v39 = vmax.f32 %v141_v37, 1e-24  ;;  %v137_v40 = vpop.xlane.xlu2 %136 }
  0x85   :  { %v665_v41 = vmax.f32 %v137_v40, 1e-24 }
  0x86   :  { %436 = vrsqrt.f32 %v161_v38  ;;  %vm318_vm1 = vweird.f32 %v161_v38  ;;  %vm298_vm3 = vweird.f32 %v663_v39 }
  0x87   :  { %438 = vrsqrt.f32 %v663_v39  ;;  %vm278_vm11 = vweird.f32 %v665_v41 }
  0x88   :  { %440 = vrsqrt.f32 %v665_v41 }
  0x8b   :  { %v143_v42 = vpop.xlane.xlu0 %142  ;;  %v139_v43 = vpop.xlane.xlu1 %138 }
  0x8c   :  { %v437_v44 = vpop.eup %436  ;;  %v160_v45 = vmax.f32 %v143_v42, 1e-24  ;;  %v669_v46 = vmax.f32 %v139_v43, 1e-24  ;;  %v135_v47 = vpop.xlane.xlu2 %134 }
  0x8d   :  { %v671_v48 = vpop.eup %438  ;;  %v313_v49 = vmul.f32 %v437_v44, %v161_v38  ;;  %v673_v50 = vmax.f32 %v135_v47, 1e-24  ;;  %vm319_vm0 = vweird.f32 %v437_v44 }
  0x8e   :  { %v293_v51 = vmul.f32 %v671_v48, %v663_v39  ;;  %442 = vrsqrt.f32 %v160_v45  ;;  %v678_v53 = vpop.eup %440  ;;  %vm320_vm2 = vmor %vm318_vm1, %vm319_vm0  ;;  %vm308_vm5 = vweird.f32 %v160_v45  ;;  %vm299_vm6 = vweird.f32 %v671_v48 }
  0x8f   :  { %v314_v52 = vmul.f32 %v437_v44, %v313_v49  ;;  %444 = vrsqrt.f32 %v669_v46  ;;  %v273_v56 = vmul.f32 %v678_v53, %v665_v41  ;;  %vm288_vm8 = vweird.f32 %v669_v46  ;;  %vm300_vm9 = vmor %vm298_vm3, %vm299_vm6 }
  0x90   :  { %446 = vrsqrt.f32 %v673_v50  ;;  %v294_v55 = vmul.f32 %v671_v48, %v293_v51  ;;  %vm279_vm12 = vweird.f32 %v678_v53  ;;  %vm268_vm15 = vweird.f32 %v673_v50 }
  0x91   :  { %v315_v54 = vmul.f32 0.5, %v314_v52  ;;  %v274_v16 = vmul.f32 %v678_v53, %v273_v56  ;;  %vm750_vm14 = vmor %vm278_vm11, %vm279_vm12 }
  0x92   :  { %v295_v4 = vmul.f32 0.5, %v294_v55 }
  0x93   :  { %v133_v57 = vpop.xlane.xlu0 %132  ;;  %v131_v58 = vpop.xlane.xlu1 %130  ;;  %v316_v59 = vsub.f32 1.5, %v315_v54  ;;  %v275_v33 = vmul.f32 0.5, %v274_v16 }
  0x94   :  { %v443_v60 = vpop.eup %442  ;;  %v684_v61 = vmax.f32 %v133_v57, 1e-24  ;;  %v686_v62 = vmax.f32 %v131_v58, 1e-24  ;;  %v129_v63 = vpop.xlane.xlu2 %128  ;;  %v296_v27 = vsub.f32 1.5, %v295_v4 }
  0x95   :  { %v688_v3 = vpop.eup %444  ;;  %v303_v5 = vmul.f32 %v443_v60, %v160_v45  ;;  %v317_v9 = vmul.f32 %v437_v44, %v316_v59  ;;  %v695_v15 = vmax.f32 %v129_v63, 1e-24  ;;  %vm309_vm4 = vweird.f32 %v443_v60 }
  0x96   :  { %v690_v10 = vpop.eup %446  ;;  %v283_v11 = vmul.f32 %v688_v3, %v669_v46  ;;  %448 = vrsqrt.f32 %v684_v61  ;;  %v297_v49 = vmul.f32 %v671_v48, %v296_v27  ;;  %vm310_vm7 = vmor %vm308_vm5, %vm309_vm4  ;;  %v276_v52 = vsub.f32 1.5, %v275_v33 }
  0x97   :  { %v304_v17 = vmul.f32 %v443_v60, %v303_v5  ;;  %450 = vrsqrt.f32 %v686_v62  ;;  %v263_v22 = vmul.f32 %v690_v10, %v673_v50  ;;  %v321_v23 = vsel %vm320_vm2, %v437_v44, %v317_v9 }
  0x98   :  { %v284_v21 = vmul.f32 %v688_v3, %v283_v11  ;;  %v337_v29 = vmul.f32 %v321_v23, %v591_v0  ;;  %452 = vrsqrt.f32 %v695_v15  ;;  %vm289_vm10 = vweird.f32 %v688_v3 }
  0x99   :  { %v305_v28 = vmul.f32 0.5, %v304_v17  ;;  %v264_v40 = vmul.f32 %v690_v10, %v263_v22  ;;  %vm290_vm13 = vmor %vm288_vm8, %vm289_vm10  ;;  %v277_v11 = vmul.f32 %v678_v53, %v276_v52  ;;  %vm269_vm0 = vweird.f32 %v690_v10 }
  0x9a   :  { %v285_v32 = vmul.f32 0.5, %v284_v21  ;;  %339 = vmatpush.xpose.msra.mxu0 %v337_v29  ;;  %vm773_vm1 = vmor %vm268_vm15, %vm269_vm0  ;;  %vm258_vm2 = vweird.f32 %v684_v61  ;;  %vm248_vm4 = vweird.f32 %v686_v62 }
  0x9b   :  { %v306_v35 = vsub.f32 1.5, %v305_v28  ;;  %v127_v36 = vpop.xlane.xlu0 %126  ;;  %v125_v37 = vpop.xlane.xlu1 %124  ;;  %v265_v58 = vmul.f32 0.5, %v264_v40  ;;  %v281_v28 = vsel %vm750_vm14, %v678_v53, %v277_v11 }
  0x9c   :  { %v705_v38 = vpop.eup %448  ;;  %v708_v42 = vmax.f32 %v127_v36, 1e-24  ;;  %v286_v43 = vsub.f32 1.5, %v285_v32  ;;  %v716_v51 = vmax.f32 %v125_v37, 1e-24  ;;  %v123_v54 = vpop.xlane.xlu2 %122 }
  0x9d   :  { %v711_v0 = vpop.eup %450  ;;  %v253_v44 = vmul.f32 %v705_v38, %v684_v61  ;;  %v307_v47 = vmul.f32 %v443_v60, %v306_v35  ;;  %v266_v16 = vsub.f32 1.5, %v265_v58  ;;  %vm259_vm3 = vweird.f32 %v705_v38 }
  0x9e   :  { %v719_v55 = vpop.eup %452  ;;  %v243_v56 = vmul.f32 %v711_v0, %v686_v62  ;;  %454 = vrsqrt.f32 %v708_v42  ;;  %v287_v63 = vmul.f32 %v688_v3, %v286_v43  ;;  %vm249_vm5 = vweird.f32 %v711_v0  ;;  %vm804_vm6 = vmor %vm258_vm2, %vm259_vm3 }
  0x9f   :  { %v311_v45 = vsel %vm310_vm7, %v443_v60, %v307_v47  ;;  %v254_v59 = vmul.f32 %v705_v38, %v253_v44  ;;  %v301_v60 = vsel %vm300_vm9, %v671_v48, %v297_v49  ;;  %456 = vrsqrt.f32 %v716_v51  ;;  %vm818_vm8 = vmor %vm248_vm4, %vm249_vm5 }
  0xa0   :  { %v336_v57 = vmul.f32 %v311_v45, %v603_v6  ;;  %v735_v6 = vmax.f32 %v123_v54, 1e-24  ;;  %v233_v39 = vmul.f32 %v719_v55, %v695_v15  ;;  %v244_v5 = vmul.f32 %v711_v0, %v243_v56 }
  0xa1   :  { %v335_v9 = vmul.f32 %v301_v60, %v593_v1  ;;  %v255_v17 = vmul.f32 0.5, %v254_v59  ;;  %v291_v21 = vsel %vm290_vm13, %v688_v3, %v287_v63  ;;  %v267_v33 = vmul.f32 %v690_v10, %v266_v16 }
  0xa2   :  { %340 = vmatpush.xpose.msra.mxu0 %v336_v57  ;;  %458 = vrsqrt.f32 %v735_v6  ;;  %v234_v1 = vmul.f32 %v719_v55, %v233_v39  ;;  %v245_v41 = vmul.f32 0.5, %v244_v5  ;;  %v334_v27 = vmul.f32 %v291_v21, %v605_v7 }
  0xa3   :  { %v119_v4 = vpop.xlane.xlu1 %118  ;;  %v121_v48 = vpop.xlane.xlu0 %120  ;;  %v256_v29 = vsub.f32 1.5, %v255_v17  ;;  %v333_v44 = vmul.f32 %v281_v28, %v595_v2  ;;  %v271_v52 = vsel %vm773_vm1, %v690_v10, %v267_v33  ;;  %vm238_vm7 = vweird.f32 %v695_v15 }
  0xa4   :  { %v754_v23 = vpop.eup %454  ;;  %v759_v46 = vmax.f32 %v121_v48, 1e-24  ;;  %v770_v50 = vmax.f32 %v119_v4, 1e-24  ;;  %v235_v7 = vmul.f32 0.5, %v234_v1  ;;  %v117_v37 = vpop.xlane.xlu2 %116  ;;  %v246_v43 = vsub.f32 1.5, %v245_v41 }
  0xa5   :  { %v762_v3 = vpop.eup %456  ;;  %v223_v32 = vmul.f32 %v754_v23, %v708_v42  ;;  %v257_v45 = vmul.f32 %v705_v38, %v256_v29  ;;  %v795_v2 = vmax.f32 %v117_v37, 1e-24  ;;  %v332_v58 = vmul.f32 %v271_v52, %v607_v8 }
  0xa6   :  { %341 = vmatpush.xpose.msra.mxu0 %v335_v9  ;;  %v213_v36 = vmul.f32 %v762_v3, %v716_v51  ;;  %460 = vrsqrt.f32 %v759_v46  ;;  %v236_v54 = vsub.f32 1.5, %v235_v7  ;;  %v247_v4 = vmul.f32 %v711_v0, %v246_v43 }
  0xa7   :  { %v224_v49 = vmul.f32 %v754_v23, %v223_v32  ;;  %462 = vrsqrt.f32 %v770_v50  ;;  %v261_v39 = vsel %vm804_vm6, %v705_v38, %v257_v45  ;;  %vm239_vm9 = vweird.f32 %v719_v55 }
  0xa8   :  { %v781_v40 = vpop.eup %458  ;;  %v214_v56 = vmul.f32 %v762_v3, %v213_v36  ;;  %v237_v48 = vmul.f32 %v719_v55, %v236_v54  ;;  %v331_v62 = vmul.f32 %v261_v39, %v615_v12  ;;  %v251_v41 = vsel %vm818_vm8, %v711_v0, %v247_v4  ;;  %vm840_vm10 = vmor %vm238_vm7, %vm239_vm9 }
  0xa9   :  { %v203_v57 = vmul.f32 %v781_v40, %v735_v6  ;;  %v225_v60 = vmul.f32 0.5, %v224_v49  ;;  %vm228_vm11 = vweird.f32 %v708_v42  ;;  %vm229_vm12 = vweird.f32 %v754_v23 }
  0xaa   :  { %342 = vmatpush.xpose.msra.mxu0 %v334_v27  ;;  %v215_v5 = vmul.f32 0.5, %v214_v56  ;;  %v330_v33 = vmul.f32 %v251_v41, %v617_v13  ;;  %v241_v35 = vsel %vm840_vm10, %v719_v55, %v237_v48  ;;  %vm218_vm15 = vweird.f32 %v716_v51  ;;  %vm863_vm0 = vmor %vm228_vm11, %vm229_vm12 }
  0xab   :  { %v64_v53 = vpop.xlane.xlu1 %63  ;;  %v115_v63 = vpop.xlane.xlu0 %114  ;;  %v204_v38 = vmul.f32 %v781_v40, %v203_v57  ;;  %v226_v22 = vsub.f32 1.5, %v225_v60  ;;  %vm219_vm1 = vweird.f32 %v762_v3  ;;  %v329_v52 = vmul.f32 %v241_v35, %v619_v14 }
  0xac   :  { %v784_v47 = vmax.f32 %v64_v53, 1e-24  ;;  %v808_v59 = vpop.eup %460  ;;  %v829_v17 = vmax.f32 %v115_v63, 1e-24  ;;  %v216_v28 = vsub.f32 1.5, %v215_v5  ;;  %vm882_vm3 = vmor %vm218_vm15, %vm219_vm1  ;;  %vm208_vm4 = vweird.f32 %v735_v6 }
  0xad   :  { %v823_v61 = vpop.eup %462  ;;  %v193_v16 = vmul.f32 %v808_v59, %v759_v46  ;;  %v205_v29 = vmul.f32 0.5, %v204_v38  ;;  %v227_v36 = vmul.f32 %v754_v23, %v226_v22  ;;  %vm209_vm5 = vweird.f32 %v781_v40 }
  0xae   :  { %343 = vmatpush.xpose.msra.mxu0 %v333_v44  ;;  %464 = vrsqrt.f32 %v784_v47  ;;  %v183_v12 = vmul.f32 %v823_v61, %v770_v50  ;;  %vm72_vm13 = vweird.f32 %v784_v47  ;;  %v217_v42 = vmul.f32 %v762_v3, %v216_v28  ;;  %vm903_vm8 = vmor %vm208_vm4, %vm209_vm5 }
  0xaf   :  { %466 = vrsqrt.f32 %v795_v2  ;;  %v194_v15 = vmul.f32 %v808_v59, %v193_v16  ;;  %v206_v44 = vsub.f32 1.5, %v205_v29  ;;  %v231_v56 = vsel %vm863_vm0, %v754_v23, %v227_v36 }
  0xb0   :  { %v184_v53 = vmul.f32 %v823_v61, %v183_v12  ;;  %v328_v51 = vmul.f32 %v231_v56, %v627_v18  ;;  %v221_v39 = vsel %vm882_vm3, %v762_v3, %v217_v42  ;;  %vm198_vm9 = vweird.f32 %v759_v46 }
  0xb1   :  { %v207_v4 = vmul.f32 %v781_v40, %v206_v44  ;;  %vm199_vm10 = vweird.f32 %v808_v59  ;;  %vm178_vm0 = vweird.f32 %v795_v2  ;;  %vm168_vm3 = vweird.f32 %v829_v17 }
  0xb2   :  { %344 = vmatpush.xpose.msra.mxu0 %v332_v58  ;;  %v185_v14 = vmul.f32 0.5, %v184_v53  ;;  %vm915_vm12 = vmor %vm198_vm9, %vm199_vm10 }
  0xb3   :  { %v397_v9 = vpop.xlane.xlu1 %396  ;;  %v211_v6 = vsel %vm903_vm8, %v781_v40, %v207_v4 }
  0xb4   :  { %v465_v11 = vpop.eup %464  ;;  %v832_v21 = vmax.f32 %v397_v9, 1e-24  ;;  %v186_v9 = vsub.f32 1.5, %v185_v14 }
  0xb5   :  { %v67_v1 = vmul.f32 %v465_v11, %v784_v47  ;;  %v849_v0 = vpop.eup %466  ;;  %vm73_vm14 = vweird.f32 %v465_v11  ;;  %v195_v47 = vmul.f32 0.5, %v194_v15 }
  0xb6   :  { %345 = vmatpush.xpose.msra.mxu0 %v331_v62  ;;  %468 = vrsqrt.f32 %v832_v21  ;;  %v173_v55 = vmul.f32 %v849_v0, %v795_v2  ;;  %vm870_vm2 = vmor %vm72_vm13, %vm73_vm14  ;;  %vm405_vm6 = vweird.f32 %v832_v21  ;;  %vm188_vm13 = vweird.f32 %v770_v50 }
  0xb7   :  { %v68_v32 = vmul.f32 %v465_v11, %v67_v1  ;;  %470 = vrsqrt.f32 %v829_v17  ;;  %v196_v63 = vsub.f32 1.5, %v195_v47  ;;  %vm189_vm14 = vweird.f32 %v823_v61 }
  0xb8   :  { %v174_v10 = vmul.f32 %v849_v0, %v173_v55  ;;  %v187_v28 = vmul.f32 %v823_v61, %v186_v9  ;;  %vm190_vm15 = vmor %vm188_vm13, %vm189_vm14  ;;  %vm179_vm1 = vweird.f32 %v849_v0 }
  0xb9   :  { %v69_v7 = vmul.f32 0.5, %v68_v32  ;;  %v197_v62 = vmul.f32 %v808_v59, %v196_v63 }
  0xba   :  { %346 = vmatpush.xpose.msra.mxu0 %v330_v33  ;;  %v175_v48 = vmul.f32 0.5, %v174_v10 }
  0xbb   :  { %v70_v13 = vsub.f32 1.5, %v69_v7  ;;  %v201_v12 = vsel %vm915_vm12, %v808_v59, %v197_v62  ;;  %v560_v7 = vmov 0  }
  0xbc   :  { %v469_v43 = vpop.eup %468  ;;  %v176_v40 = vsub.f32 1.5, %v175_v48  ;;  %435 = vset.pattern.permute.xlu0 %v560_v7 }
  0xbd   :  { %v71_v45 = vmul.f32 %v465_v11, %v70_v13  ;;  %v400_v54 = vmul.f32 %v469_v43, %v832_v21  ;;  %v886_v58 = vpop.eup %470  ;;  %vm406_vm7 = vweird.f32 %v469_v43 }
  0xbe   :  { %347 = vmatpush.xpose.msra.mxu0 %v329_v52  ;;  %v163_v8 = vmul.f32 %v886_v58, %v829_v17  ;;  %vm407_vm11 = vmor %vm405_vm6, %vm406_vm7  ;;  %v177_v50 = vmul.f32 %v849_v0, %v176_v40  ;;  %vm169_vm4 = vweird.f32 %v886_v58  ;;  %vm79_vm6 = vcmask 7168  }
  0xbf   :  { %v401_v60 = vmul.f32 %v469_v43, %v400_v54  ;;  %v75_v23 = vsel %vm870_vm2, %v465_v11, %v71_v45  ;;  %v327_v11 = vmul.f32 %v221_v39, %v629_v19  ;;  %v326_v19 = vmul.f32 %v211_v6, %v631_v20  ;;  %vm180_vm2 = vmor %vm178_vm0, %vm179_vm1 }
  0xc0   :  { %v76_v18 = vmul.f32 20.0, %v75_v23  ;;  %v164_v16 = vmul.f32 %v886_v58, %v163_v8  ;;  %v181_v2 = vsel %vm180_vm2, %v849_v0, %v177_v50  ;;  %vm170_vm5 = vmor %vm168_vm3, %vm169_vm4  ;;  %v559_v17 = vmov -inf  }
  0xc1   :  { %v402_v5 = vmul.f32 0.5, %v401_v60  ;;  %80 = vst.msk [vmem:[#allocation3] sm:$0xff] %vm79_vm6, %v559_v17 }
  0xc2   :  { %348 = vmatpush.xpose.msra.mxu0 %v328_v51  ;;  %v77_v22 = vmul.f32 %v76_v18, %v651_v30  ;;  %v165_v27 = vmul.f32 0.5, %v164_v16  ;;  %v325_v30 = vmul.f32 %v201_v12, %v641_v25  ;;  %v323_v25 = vmul.f32 %v181_v2, %v643_v26 }
  0xc3   :  { %v403_v3 = vsub.f32 1.5, %v402_v5  ;;  %v561_v26 = vmov 0.0  }
  0xc4   :  { %v166_v20 = vsub.f32 1.5, %v165_v27  ;;  %81 = vst.msk [vmem:[#allocation4] sm:$0xff] %vm79_vm6, %v561_v26 }
  0xc5   :  { %v404_v21 = vmul.f32 %v469_v43, %v403_v3 }
  0xc6   :  { %349 = vmatpush.xpose.msra.mxu0 %v327_v11  ;;  %v167_v32 = vmul.f32 %v886_v58, %v166_v20 }
  0xc7   :  { %v408_v1 = vsel %vm407_vm11, %v469_v43, %v404_v21 }
  0xc8   :  { %v409_v41 = vmul.f32 %v408_v1, %v659_v34  ;;  %v191_v34 = vsel %vm190_vm15, %v823_v61, %v187_v28  ;;  %v171_v61 = vsel %vm170_vm5, %v886_v58, %v167_v32  ;;  %v368_v36 = vld [vmem:[#allocation3] sm:$0xff] }
  0xc9   :  { %v324_v59 = vmul.f32 %v191_v34, %v639_v24  ;;  %v322_v15 = vmul.f32 %v171_v61, %v653_v31  ;;  %v360_v24 = vlaneseq }
  0xca   :  { %350 = vmatpush.xpose.msra.mxu0 %v326_v19  ;;  %v411_v29 = vmul.f32 %v409_v41, %v77_v22 }
  0xcb   :  { %v361_v33 = vand.u32 127, %v360_v24  ;;  %v372_v52 = vld [vmem:[#allocation4] sm:$0xff] }
  0xcc   :  { %412 = vadd.xlane.f32.xlu1 %v411_v29 }
  0xcd   :  { %vm364_vm7 = vcmp.lt.s32.totalorder %v361_v33, 16 }
  0xce   :  { %351 = vmatpush.xpose.msra.mxu0 %v325_v30 }
  0xd2   :  { %352 = vmatpush.xpose.msra.mxu0 %v324_v59 }
  0xd6   :  { %353 = vmatpush.xpose.msra.mxu0 %v323_v25 }
  0xda   :  { %354 = vmatpush.xpose.msra.mxu0 %v322_v15 }
  0xdd   :  { %355 = vmatmul.f32.vlgmr.msra.gmra.mxu0 %v77_v22 }
 0x13f   :  { %v413_v60 = vpop.xlane.xlu1 %412 }
 0x15a   :  { %v356_v0 = vpop.f32.mrf.mxu0 }
 0x15b   :  { %v367_v35 = vsel %vm364_vm7, %v356_v0, -1e+30 }
 0x15c   :  { %369 = vmax.xlane.f32.xlu2 %v367_v35 }
 0x1cf   :  { %v370_v53 = vpop.xlane.xlu2 %369 }
 0x1d0   :  { %v371_v31 = vmax.f32 %v368_v36, %v370_v53 }
 0x1d2   :  { %v373_v37 = vsub.f32 %v368_v36, %v371_v31  ;;  %390 = vst.msk [vmem:[#allocation3] sm:$0xff] %vm79_vm6, %v371_v31  ;;  %379 = vperm.xlu0 %435, %v371_v31  }
 0x1d4   :  { %v374_v47 = vmul.f32 1.442695, %v373_v37 }
 0x1d9   :  { %v414_v14 = vld [vmem:[#allocation3] sm:$0xff] }
 0x244   :  { %v380_v13 = vpop.permute.xlu0 %379 }
 0x245   :  { %v382_v55 = vsub.f32 %v367_v35, %v380_v13 }
 0x247   :  { %v383_v43 = vmul.f32 1.442695, %v382_v55 }
 0x249   :  { %472 = vpow2.f32 %v383_v43 }
 0x24a   :  { %474 = vpow2.f32 %v374_v47 }
 0x24f   :  { %v473_v44 = vpop.eup %472 }
 0x250   :  { %385 = vadd.xlane.f32.xlu2 %v473_v44  ;;  %v475_v49 = vpop.eup %474 }
 0x251   :  { %v376_v42 = vmul.f32 %v475_v49, %v372_v52 }
 0x2c3   :  { %v386_v45 = vpop.xlane.xlu2 %385 }
 0x2c4   :  { %v387_v54 = vadd.f32 %v386_v45, %v376_v42 }
 0x2c6   :  { %389 = vst.msk [vmem:[#allocation4] sm:$0xff] %vm79_vm6, %v387_v54 }
 0x2cd   :  { %v415_v56 = vld [vmem:[#allocation4] sm:$0xff] }
 0x2ce   :  { %476 = vlog2.f32 %v415_v56 }
 0x2d4   :  { %v477_v57 = vpop.eup %476 }
 0x2d5   :  { %v417_v58 = vmul.f32 0.6931472, %v477_v57 }
 0x2d7   :  { %v418_v10 = vadd.f32 %v417_v58, %v414_v14 }
 0x2d9   :  { %v419_v23 = vsub.f32 %v418_v10, %v413_v60 }
 0x2db   :  { %420 = vst.msk [vmem:[%s952_s3] sm:$0xff] %vm79_vm6, %v419_v23 }
 0x2dc   :  { %425 = vsyncpa [#allocation6], 1 }
 0x2dd   :  { %426 = vsyncpa [#allocation8], 1 }

</bundles_post_ra>
